<compile_context>
chip_gen: v7x
topology: tpu7x:2x2x1
jax: 0.10.0
libtpu: 0.0.40
codegen_flags: <defaults>
</compile_context>

<pallas_src>
import functools

import jax
import jax.numpy as jnp
from jax import lax
from jax.experimental import pallas as pl
from jax.experimental.pallas import tpu as pltpu


def _fused_kernel(Wp, x_ref, wd_ref, b1_ref, wp_ref, b2_ref, o_ref):
    # x_ref : (1, C, L)   one image; channels on sublanes, flat padded spatial on lanes
    # wd_ref: (C, 9)      BN1-folded depthwise 3x3 weights (tap index = kh*3 + kw)
    # b1_ref: (C, 1)      BN1-folded depthwise bias
    # wp_ref: (Cout, C)   BN2-folded pointwise weights
    # b2_ref: (Cout, 1)   BN2-folded pointwise bias
    # o_ref : (1, Cout, L)
    x = x_ref[0].astype(jnp.float32)                 # (C, L)
    C, L = x.shape
    Cout = o_ref.shape[1]

    # ---- depthwise 3x3: 9 lane rotations (XLU) + per-channel broadcast FMAs (VPU) ----
    wd = wd_ref[...]                                 # (C, 9)
    acc = jnp.broadcast_to(b1_ref[...], (C, L))      # folded bias, broadcast once
    for kh in range(3):
        for kw in range(3):
            s = (kh - 1) * Wp + (kw - 1)             # flat tap offset from window center
            xs = x if s == 0 else pltpu.roll(x, shift=(-s) % L, axis=1)
            k = kh * 3 + kw
            acc = acc + xs * wd[:, k:k + 1]
    h = jnp.maximum(acc, 0.0)                        # BN1 already folded; ReLU only

    # ---- pointwise 1x1: Cin broadcast FMAs over (Cout, L) planes (VPU, no MXU) ----
    wp = wp_ref[...]                                 # (Cout, C)
    out = jnp.broadcast_to(b2_ref[...], (Cout, L))   # folded bias, broadcast once
    for c in range(C):
        out = out + h[c:c + 1, :] * wp[:, c:c + 1]
    o_ref[0] = jnp.maximum(out, 0.0).astype(o_ref.dtype)


def depthwise_conv_pallas(x_nchw, params, *, stride=1, padding=1):
    """x_nchw: (N, C, H, W) float32. Returns (N, Cout, Ho, Wo)."""
    wd_kern, bd, s1, b1, wp_kern, bp, s2, b2 = params
    N, C, H, W = x_nchw.shape
    Cout = wp_kern.shape[1]
    Ho = (H + 2 * padding - 3) // stride + 1
    Wo = (W + 2 * padding - 3) // stride + 1
    Hp, Wp = H + 2 * padding, W + 2 * padding

    # Fold BN1 into the depthwise weights/bias, BN2 into the pointwise weights/bias.
    wd_f = wd_kern.reshape(9, C).T * s1[:, None]          # (C, 9)
    b1_f = (bd * s1 + b1)[:, None]                        # (C, 1)
    wp_f = wp_kern.T * s2[:, None]                        # (Cout, C)
    b2_f = (bp * s2 + b2)[:, None]                        # (Cout, 1)

    # Layout plumbing: NCHW -> zero-pad spatially -> flatten spatial onto the lane
    # axis, padded to a multiple of 128 lanes (lane-dense vregs, unmasked stores).
    Limg = Hp * Wp
    Lpad = ((Limg + 127) // 128) * 128
    x_pad = jnp.pad(x_nchw, ((0, 0), (0, 0), (padding, padding), (padding, padding)))
    x_flat = jnp.pad(x_pad.reshape(N, C, Limg), ((0, 0), (0, 0), (0, Lpad - Limg)))

    kernel = functools.partial(_fused_kernel, Wp)
    y = pl.pallas_call(
        kernel,
        out_shape=jax.ShapeDtypeStruct((N, Cout, Lpad), x_nchw.dtype),
        grid=(N,),
        in_specs=[
            pl.BlockSpec((1, C, Lpad), lambda n: (n, 0, 0)),
            pl.BlockSpec((C, 9), lambda n: (0, 0)),
            pl.BlockSpec((C, 1), lambda n: (0, 0)),
            pl.BlockSpec((Cout, C), lambda n: (0, 0)),
            pl.BlockSpec((Cout, 1), lambda n: (0, 0)),
        ],
        out_specs=pl.BlockSpec((1, Cout, Lpad), lambda n: (n, 0, 0)),
        compiler_params=pltpu.CompilerParams(dimension_semantics=("parallel",)),
    )(x_flat, wd_f, b1_f, wp_f, b2_f)

    # Extract the valid conv outputs: window centers sit at padded coordinates
    # (1 + stride*ho, 1 + stride*wo). Junk at padding rows / lane tail is dropped here.
    y_img = y[:, :, :Limg].reshape(N, Cout, Hp, Wp)
    return y_img[:, :, 1::stride, 1::stride][:, :, :Ho, :Wo]


def _reference(x_nchw, raw, *, stride=1, padding=1, eps=1e-5):
    """Pure-JAX reference matching PyTorch eval-mode forward."""
    (wd_oihw, bd, g1, be1, m1, v1, wp_oihw, bp, g2, be2, m2, v2) = raw
    C = x_nchw.shape[1]
    dw = lax.conv_general_dilated(
        x_nchw, wd_oihw, window_strides=(stride, stride),
        padding=[(padding, padding), (padding, padding)],
        dimension_numbers=("NCHW", "OIHW", "NCHW"),
        feature_group_count=C,
    ) + bd[None, :, None, None]
    h = (dw - m1[None, :, None, None]) / jnp.sqrt(v1 + eps)[None, :, None, None]
    h = h * g1[None, :, None, None] + be1[None, :, None, None]
    h = jnp.maximum(h, 0.0)
    pw = lax.conv_general_dilated(
        h, wp_oihw, window_strides=(1, 1), padding=[(0, 0), (0, 0)],
        dimension_numbers=("NCHW", "OIHW", "NCHW"),
    ) + bp[None, :, None, None]
    o = (pw - m2[None, :, None, None]) / jnp.sqrt(v2 + eps)[None, :, None, None]
    o = o * g2[None, :, None, None] + be2[None, :, None, None]
    return jnp.maximum(o, 0.0)


if __name__ == "__main__":
    # Module config: nin=4, kernels_per_layer=1, nout=8, stride=1, padding=1.
    nin, kpl, nout, stride, padding = 4, 1, 8, 1, 1
    N, H, W = 2, 16, 16
    eps = 1e-5

    key = jax.random.PRNGKey(0)
    ks = jax.random.split(key, 12)

    x = jax.random.normal(ks[0], (N, nin, H, W), dtype=jnp.float32)

    # Deterministic synthetic parameters (PyTorch shapes), float32.
    wd_oihw = 0.2 * jax.random.normal(ks[1], (nin * kpl, 1, 3, 3), jnp.float32)
    bd = 0.1 * jax.random.normal(ks[2], (nin * kpl,), jnp.float32)
    g1 = 1.0 + 0.2 * jax.random.normal(ks[3], (nin * kpl,), jnp.float32)
    be1 = 0.1 * jax.random.normal(ks[4], (nin * kpl,), jnp.float32)
    m1 = 0.05 * jax.random.normal(ks[5], (nin * kpl,), jnp.float32)
    v1 = 1.0 + 0.1 * jax.random.uniform(ks[6], (nin * kpl,), jnp.float32)

    wp_oihw = 0.2 * jax.random.normal(ks[7], (nout, nin * kpl, 1, 1), jnp.float32)
    bp = 0.1 * jax.random.normal(ks[8], (nout,), jnp.float32)
    g2 = 1.0 + 0.2 * jax.random.normal(ks[9], (nout,), jnp.float32)
    be2 = 0.1 * jax.random.normal(ks[10], (nout,), jnp.float32)
    m2 = 0.05 * jax.random.normal(ks[11], (nout,), jnp.float32)
    v2 = 1.0 + 0.1 * jax.random.uniform(ks[0], (nout,), jnp.float32)

    # Fold BN into per-channel scale/bias (inference-mode BatchNorm).
    s1 = g1 / jnp.sqrt(v1 + eps)
    b1 = be1 - m1 * s1
    s2 = g2 / jnp.sqrt(v2 + eps)
    b2 = be2 - m2 * s2

    # Kernel-layout weights: depthwise (3,3,C), pointwise (C, Cout).
    wd_kern = jnp.transpose(wd_oihw[:, 0], (1, 2, 0))   # (3, 3, C)
    wp_kern = jnp.transpose(wp_oihw[:, :, 0, 0])        # (C, Cout)

    params = (wd_kern, bd, s1, b1, wp_kern, bp, s2, b2)
    raw = (wd_oihw, bd, g1, be1, m1, v1, wp_oihw, bp, g2, be2, m2, v2)

    # stride=1 (module default config)
    out = depthwise_conv_pallas(x, params, stride=stride, padding=padding)
    out = jax.block_until_ready(out)
    ref = _reference(x, raw, stride=stride, padding=padding, eps=eps)
    assert out.shape == (N, nout, H, W), out.shape
    assert jnp.allclose(out, ref, rtol=1e-4, atol=1e-4), \
        float(jnp.max(jnp.abs(out - ref)))

    # Also exercise the strided path (stride handled by wrapper-side extraction).
    out2 = jax.block_until_ready(depthwise_conv_pallas(x, params, stride=2, padding=1))
    ref2 = _reference(x, raw, stride=2, padding=1, eps=eps)
    assert out2.shape == ref2.shape, (out2.shape, ref2.shape)
    assert jnp.allclose(out2, ref2, rtol=1e-4, atol=1e-4), \
        float(jnp.max(jnp.abs(out2 - ref2)))

    print("KERNEL_OK")
</pallas_src>

<mosaic_0001>
module attributes {stable_mosaic.version = 11 : i64} {
  func.func @_fused_kernel(%arg0: i32, %arg1: memref<1x4x384xf32, #tpu.memory_space<vmem>>, %arg2: memref<4x9xf32, #tpu.memory_space<vmem>>, %arg3: memref<4x1xf32, #tpu.memory_space<vmem>>, %arg4: memref<8x4xf32, #tpu.memory_space<vmem>>, %arg5: memref<8x1xf32, #tpu.memory_space<vmem>>, %arg6: memref<1x8x384xf32, #tpu.memory_space<vmem>>) attributes {dimension_semantics = [#tpu.dimension_semantics<parallel>], iteration_bounds = array<i64: 2>, scalar_prefetch = 0 : i64, scratch_operands = 0 : i64, tpu.core_type = #tpu.core_type<tc>, window_params = [{transform_indices = @transform_0, window_bounds = array<i64: 1, 4, 384>}, {pipeline_mode = #tpu.pipeline_mode<synchronous>, transform_indices = @transform_1, window_bounds = array<i64: 4, 9>}, {pipeline_mode = #tpu.pipeline_mode<synchronous>, transform_indices = @transform_2, window_bounds = array<i64: 4, 1>}, {pipeline_mode = #tpu.pipeline_mode<synchronous>, transform_indices = @transform_3, window_bounds = array<i64: 8, 4>}, {pipeline_mode = #tpu.pipeline_mode<synchronous>, transform_indices = @transform_4, window_bounds = array<i64: 8, 1>}, {transform_indices = @transform_5, window_bounds = array<i64: 1, 8, 384>}]} {
    %c0 = arith.constant 0 : index
    %c0_0 = arith.constant 0 : index
    %c0_1 = arith.constant 0 : index
    %0 = vector.load %arg1[%c0, %c0_0, %c0_1] : memref<1x4x384xf32, #tpu.memory_space<vmem>>, vector<1x4x384xf32>
    %1 = vector.shape_cast %0 : vector<1x4x384xf32> to vector<4x384xf32>
    %c0_2 = arith.constant 0 : index
    %c0_3 = arith.constant 0 : index
    %2 = vector.load %arg2[%c0_2, %c0_3] : memref<4x9xf32, #tpu.memory_space<vmem>>, vector<4x9xf32>
    %c0_4 = arith.constant 0 : index
    %c0_5 = arith.constant 0 : index
    %3 = vector.load %arg3[%c0_4, %c0_5] : memref<4x1xf32, #tpu.memory_space<vmem>>, vector<4x1xf32>
    %4 = vector.shape_cast %3 : vector<4x1xf32> to vector<4x1xf32>
    %5 = vector.broadcast %4 : vector<4x1xf32> to vector<4x384xf32>
    %c19_i32 = arith.constant 19 : i32
    %6 = tpu.dynamic_rotate %1 by %c19_i32 dim 1 : vector<4x384xf32>, i32 -> vector<4x384xf32>
    %7 = vector.extract_strided_slice %2 {offsets = [0, 0], sizes = [4, 1], strides = [1, 1]} : vector<4x9xf32> to vector<4x1xf32>
    %8 = vector.broadcast %7 : vector<4x1xf32> to vector<4x384xf32>
    %9 = arith.mulf %6, %8 : vector<4x384xf32>
    %10 = arith.addf %5, %9 : vector<4x384xf32>
    %c18_i32 = arith.constant 18 : i32
    %11 = tpu.dynamic_rotate %1 by %c18_i32 dim 1 : vector<4x384xf32>, i32 -> vector<4x384xf32>
    %12 = vector.extract_strided_slice %2 {offsets = [0, 1], sizes = [4, 1], strides = [1, 1]} : vector<4x9xf32> to vector<4x1xf32>
    %13 = vector.broadcast %12 : vector<4x1xf32> to vector<4x384xf32>
    %14 = arith.mulf %11, %13 : vector<4x384xf32>
    %15 = arith.addf %10, %14 : vector<4x384xf32>
    %c17_i32 = arith.constant 17 : i32
    %16 = tpu.dynamic_rotate %1 by %c17_i32 dim 1 : vector<4x384xf32>, i32 -> vector<4x384xf32>
    %17 = vector.extract_strided_slice %2 {offsets = [0, 2], sizes = [4, 1], strides = [1, 1]} : vector<4x9xf32> to vector<4x1xf32>
    %18 = vector.broadcast %17 : vector<4x1xf32> to vector<4x384xf32>
    %19 = arith.mulf %16, %18 : vector<4x384xf32>
    %20 = arith.addf %15, %19 : vector<4x384xf32>
    %c1_i32 = arith.constant 1 : i32
    %21 = tpu.dynamic_rotate %1 by %c1_i32 dim 1 : vector<4x384xf32>, i32 -> vector<4x384xf32>
    %22 = vector.extract_strided_slice %2 {offsets = [0, 3], sizes = [4, 1], strides = [1, 1]} : vector<4x9xf32> to vector<4x1xf32>
    %23 = vector.broadcast %22 : vector<4x1xf32> to vector<4x384xf32>
    %24 = arith.mulf %21, %23 : vector<4x384xf32>
    %25 = arith.addf %20, %24 : vector<4x384xf32>
    %26 = vector.extract_strided_slice %2 {offsets = [0, 4], sizes = [4, 1], strides = [1, 1]} : vector<4x9xf32> to vector<4x1xf32>
    %27 = vector.broadcast %26 : vector<4x1xf32> to vector<4x384xf32>
    %28 = arith.mulf %1, %27 : vector<4x384xf32>
    %29 = arith.addf %25, %28 : vector<4x384xf32>
    %c383_i32 = arith.constant 383 : i32
    %30 = tpu.dynamic_rotate %1 by %c383_i32 dim 1 : vector<4x384xf32>, i32 -> vector<4x384xf32>
    %31 = vector.extract_strided_slice %2 {offsets = [0, 5], sizes = [4, 1], strides = [1, 1]} : vector<4x9xf32> to vector<4x1xf32>
    %32 = vector.broadcast %31 : vector<4x1xf32> to vector<4x384xf32>
    %33 = arith.mulf %30, %32 : vector<4x384xf32>
    %34 = arith.addf %29, %33 : vector<4x384xf32>
    %c367_i32 = arith.constant 367 : i32
    %35 = tpu.dynamic_rotate %1 by %c367_i32 dim 1 : vector<4x384xf32>, i32 -> vector<4x384xf32>
    %36 = vector.extract_strided_slice %2 {offsets = [0, 6], sizes = [4, 1], strides = [1, 1]} : vector<4x9xf32> to vector<4x1xf32>
    %37 = vector.broadcast %36 : vector<4x1xf32> to vector<4x384xf32>
    %38 = arith.mulf %35, %37 : vector<4x384xf32>
    %39 = arith.addf %34, %38 : vector<4x384xf32>
    %c366_i32 = arith.constant 366 : i32
    %40 = tpu.dynamic_rotate %1 by %c366_i32 dim 1 : vector<4x384xf32>, i32 -> vector<4x384xf32>
    %41 = vector.extract_strided_slice %2 {offsets = [0, 7], sizes = [4, 1], strides = [1, 1]} : vector<4x9xf32> to vector<4x1xf32>
    %42 = vector.broadcast %41 : vector<4x1xf32> to vector<4x384xf32>
    %43 = arith.mulf %40, %42 : vector<4x384xf32>
    %44 = arith.addf %39, %43 : vector<4x384xf32>
    %c365_i32 = arith.constant 365 : i32
    %45 = tpu.dynamic_rotate %1 by %c365_i32 dim 1 : vector<4x384xf32>, i32 -> vector<4x384xf32>
    %46 = vector.extract_strided_slice %2 {offsets = [0, 8], sizes = [4, 1], strides = [1, 1]} : vector<4x9xf32> to vector<4x1xf32>
    %47 = vector.broadcast %46 : vector<4x1xf32> to vector<4x384xf32>
    %48 = arith.mulf %45, %47 : vector<4x384xf32>
    %49 = arith.addf %44, %48 : vector<4x384xf32>
    %cst = arith.constant 0.000000e+00 : f32
    %50 = vector.broadcast %cst : f32 to vector<4x384xf32>
    %51 = arith.maximumf %49, %50 : vector<4x384xf32>
    %c0_6 = arith.constant 0 : index
    %c0_7 = arith.constant 0 : index
    %52 = vector.load %arg4[%c0_6, %c0_7] : memref<8x4xf32, #tpu.memory_space<vmem>>, vector<8x4xf32>
    %c0_8 = arith.constant 0 : index
    %c0_9 = arith.constant 0 : index
    %53 = vector.load %arg5[%c0_8, %c0_9] : memref<8x1xf32, #tpu.memory_space<vmem>>, vector<8x1xf32>
    %54 = vector.shape_cast %53 : vector<8x1xf32> to vector<8x1xf32>
    %55 = vector.broadcast %54 : vector<8x1xf32> to vector<8x384xf32>
    %56 = vector.extract_strided_slice %51 {offsets = [0, 0], sizes = [1, 384], strides = [1, 1]} : vector<4x384xf32> to vector<1x384xf32>
    %57 = vector.extract_strided_slice %52 {offsets = [0, 0], sizes = [8, 1], strides = [1, 1]} : vector<8x4xf32> to vector<8x1xf32>
    %58 = vector.broadcast %56 : vector<1x384xf32> to vector<8x384xf32>
    %59 = vector.broadcast %57 : vector<8x1xf32> to vector<8x384xf32>
    %60 = arith.mulf %58, %59 : vector<8x384xf32>
    %61 = arith.addf %55, %60 : vector<8x384xf32>
    %62 = vector.extract_strided_slice %51 {offsets = [1, 0], sizes = [1, 384], strides = [1, 1]} : vector<4x384xf32> to vector<1x384xf32>
    %63 = vector.extract_strided_slice %52 {offsets = [0, 1], sizes = [8, 1], strides = [1, 1]} : vector<8x4xf32> to vector<8x1xf32>
    %64 = vector.broadcast %62 : vector<1x384xf32> to vector<8x384xf32>
    %65 = vector.broadcast %63 : vector<8x1xf32> to vector<8x384xf32>
    %66 = arith.mulf %64, %65 : vector<8x384xf32>
    %67 = arith.addf %61, %66 : vector<8x384xf32>
    %68 = vector.extract_strided_slice %51 {offsets = [2, 0], sizes = [1, 384], strides = [1, 1]} : vector<4x384xf32> to vector<1x384xf32>
    %69 = vector.extract_strided_slice %52 {offsets = [0, 2], sizes = [8, 1], strides = [1, 1]} : vector<8x4xf32> to vector<8x1xf32>
    %70 = vector.broadcast %68 : vector<1x384xf32> to vector<8x384xf32>
    %71 = vector.broadcast %69 : vector<8x1xf32> to vector<8x384xf32>
    %72 = arith.mulf %70, %71 : vector<8x384xf32>
    %73 = arith.addf %67, %72 : vector<8x384xf32>
    %74 = vector.extract_strided_slice %51 {offsets = [3, 0], sizes = [1, 384], strides = [1, 1]} : vector<4x384xf32> to vector<1x384xf32>
    %75 = vector.extract_strided_slice %52 {offsets = [0, 3], sizes = [8, 1], strides = [1, 1]} : vector<8x4xf32> to vector<8x1xf32>
    %76 = vector.broadcast %74 : vector<1x384xf32> to vector<8x384xf32>
    %77 = vector.broadcast %75 : vector<8x1xf32> to vector<8x384xf32>
    %78 = arith.mulf %76, %77 : vector<8x384xf32>
    %79 = arith.addf %73, %78 : vector<8x384xf32>
    %cst_10 = arith.constant 0.000000e+00 : f32
    %80 = vector.broadcast %cst_10 : f32 to vector<8x384xf32>
    %81 = arith.maximumf %79, %80 : vector<8x384xf32>
    %c0_11 = arith.constant 0 : index
    %c0_12 = arith.constant 0 : index
    %c0_13 = arith.constant 0 : index
    %82 = vector.load %arg6[%c0_11, %c0_12, %c0_13] : memref<1x8x384xf32, #tpu.memory_space<vmem>>, vector<1x8x384xf32>
    %83 = vector.shape_cast %82 : vector<1x8x384xf32> to vector<8x384xf32>
    %84 = vector.shape_cast %81 : vector<8x384xf32> to vector<1x8x384xf32>
    tpu.vector_store %arg6[%c0_11, %c0_12, %c0_13], %84 {strides = array<i32>} : memref<1x8x384xf32, #tpu.memory_space<vmem>>, vector<1x8x384xf32>,
    return
  }
  func.func @transform_0(%arg0: i32) -> (i32, i32, i32) {
    %c0_i32 = arith.constant 0 : i32
    %c0_i32_0 = arith.constant 0 : i32
    %c0_i32_1 = arith.constant 0 : i32
    return %arg0, %c0_i32, %c0_i32_0 : i32, i32, i32
  }
  func.func @transform_1(%arg0: i32) -> (i32, i32) {
    %c0_i32 = arith.constant 0 : i32
    %c0_i32_0 = arith.constant 0 : i32
    %c0_i32_1 = arith.constant 0 : i32
    return %c0_i32, %c0_i32_0 : i32, i32
  }
  func.func @transform_2(%arg0: i32) -> (i32, i32) {
    %c0_i32 = arith.constant 0 : i32
    %c0_i32_0 = arith.constant 0 : i32
    %c0_i32_1 = arith.constant 0 : i32
    return %c0_i32, %c0_i32_0 : i32, i32
  }
  func.func @transform_3(%arg0: i32) -> (i32, i32) {
    %c0_i32 = arith.constant 0 : i32
    %c0_i32_0 = arith.constant 0 : i32
    %c0_i32_1 = arith.constant 0 : i32
    return %c0_i32, %c0_i32_0 : i32, i32
  }
  func.func @transform_4(%arg0: i32) -> (i32, i32) {
    %c0_i32 = arith.constant 0 : i32
    %c0_i32_0 = arith.constant 0 : i32
    %c0_i32_1 = arith.constant 0 : i32
    return %c0_i32, %c0_i32_0 : i32, i32
  }
  func.func @transform_5(%arg0: i32) -> (i32, i32, i32) {
    %c0_i32 = arith.constant 0 : i32
    %c0_i32_0 = arith.constant 0 : i32
    %c0_i32_1 = arith.constant 0 : i32
    return %arg0, %c0_i32, %c0_i32_0 : i32, i32, i32
  }
}

</mosaic_0001>

<bundles_post_ra>
// kernel: tpu_custom_call.1
= control target key start
LH: loop header
LB: loop body
LE: loop exit
PB: predicated region body
PF: predicated region fallthrough
CT: control target
= control target key end

     0   :  { %10 = vsyncpa [#allocation3], 0  ;;  %s1120_s0 = inlined_call_operand.vmem [shape: f32[2,4,384], index: 0, kind: input, shape index: {}]   ;;  %s1121_s1 = inlined_call_operand.hbm [shape: f32[4,9], index: 1, kind: input, shape index: {}]   ;;  %s1122_s2 = inlined_call_operand.vmem [shape: f32[4,1], index: 2, kind: input, shape index: {}]   ;;  %s1123_s3 = inlined_call_operand.vmem [shape: f32[8,4], index: 3, kind: input, shape index: {}]   ;;  %s1124_s4 = inlined_call_operand.vmem [shape: f32[8,1], index: 4, kind: input, shape index: {}]   ;;  %s1125_s5 = inlined_call_operand.hbm [shape: f32[2,8,384], index: 5, kind: output, shape index: {}]  }
   0x1   :  { %11 = vsyncpa [#allocation4], 0 }
   0x2   :  { %13 = vsyncpa [#allocation4 + $0x1], 0  ;;  %s863_s18 = smov 0   ;;  %s865_s19 = smov 0  }
   0x3   :  { %s867_s20 = smov 0   ;;  %s869_s21 = smov 0  }
   0x4 LB: > { %s884_s22 = sadd.s32 4294967295, %s811_s21   ;;  %s621_s23 = sadd.s32 4294967294, %s811_s21   ;;  %s811_s21 = sphi %s869_s21, %s1141_s21   ;;  %s807_s20 = sphi %s867_s20, %s1140_s20   ;;  %s803_s19 = sphi %s865_s19, %s1139_s19   ;;  %s799_s18 = sphi %s863_s18, %s1138_s18  }
   0x5   : > { %s888_s24 = sadd.s32 1, %s811_s21   ;;  %s136_s25 = sadd.s32 1, %s807_s20 }
   0x6   : > { %s133_s26 = ssub.s32 %s811_s21, %s888_s24  ;;  %p146_p0 = scmp.ne.s32.totalorder %s807_s20, %s803_s19 }
   0x7   : > { %p134_p1 = scmp.eq.s32.totalorder %s133_s26, 0  ;;  %p147_p2 = scmp.eq.s32.totalorder %s884_s22, 1 }
   0x8   : > { %p152_p3 = scmp.ne.s32.totalorder %s803_s19, %s799_s18  ;;  %p153_p4 = scmp.eq.s32.totalorder %s621_s23, 1 }
   0x9   : > { %s899_s27 = scalar_select %p134_p1, %s807_s20, %s136_s25  }
   0xa   : > { %p901_p5 = por %p147_p2, %p146_p0  ;;  %p905_p6 = por %p153_p4, %p152_p3 }
   0xb   : > { %p622_p7 = scmp.ge.s32.totalorder %s811_s21, 1  ;;  %p160_p8 = scmp.lt.s32.totalorder %s811_s21, 3 }
   0xc   : > { %s1129_s28 = scalar_select %p901_p5, 1, 0 }
   0xd   : > { %s1130_s29 = scalar_select %p905_p6, 1, 0 }
   0xe   : > { %p1126_p9 = scmp.eq.s32.totalorder %s884_s22, 0  ;;  %p912_p10 = pnand %p622_p7, %p160_p8 }
   0xf   : > { %s813_s6 = smov [#allocation2]   ;;  %s717_s11 = scalar_lea.hbm %s1121_s1, 64 }
  0x10   : > { %s1131_s30 = scalar_select %p912_p10, 1, 0 }
  0x11   : > { %s173_s7 = sshll.u32 %s813_s6, 4  ;;  %p640_p11 = pneg %p912_p10  ;;  %s174_s7 = int_to_ptr.vmem [resolvable:$true] %s173_s7 }
  0x12   : > { %p718_p13 = scmp.ne.s32.totalorder %s1121_s1, %s717_s11  ;;  %p724_p3 = scmp.lt.u32.totalorder %s717_s11, %s1121_s1 }
  0x13   : > { %p920_p12 = pnand %p1126_p9, %p640_p11 }
  0x15   : > { %p719_p0 = pneg %p920_p12 }
  0x17   : > { %p720_p1 = pnand %p719_p0, %p718_p13 }
  0x19   : > { %p721_p2 = pneg %p720_p1 }
  0x1b   : > { %p726_p4 = pnand %p724_p3, %p721_p2 }
  0x1d   : > { %729 = shalt.err (!%p726_p4)
}
  0x1e   : > { %s730_s16 = scalar_lea.vmem %s174_s7, 64  ;;  %p738_p9 = scmp.lt.s32.totalorder %s174_s7, %s174_s7 }
  0x1f   : > { %p731_p7 = scmp.ne.s32.totalorder %s174_s7, %s730_s16  ;;  %p739_p6 = scmp.lt.s32.totalorder %s730_s16, %s730_s16 }
  0x21   : > { %p733_p8 = pnand %p731_p7, %p719_p0  ;;  %p740_p5 = por %p739_p6, %p738_p9 }
  0x23   : > { %p734_p11 = pneg %p733_p8 }
  0x25   : > { %p741_p10 = pnand %p740_p5, %p734_p11 }
  0x27   : > { %744 = shalt.err (!%p741_p10)
}
  0x28   : > { %643 = dma.hbm_to_vmem [thread:$0]  (!%p920_p12), %s1121_s1, 64, %s174_s7, [#allocation3]  }
  0x29   : > { %p1133_p13 = scmp.ne.s32.totalorder %s1131_s30, 0 }
  0x2a   : > { %p1134_p1 = scmp.eq.s32.totalorder (!%p1133_p13), %s884_s22, 0 }
  0x2b   : > { %203 = sbr.rel (%p1133_p13) target bundleno = 288 (0x120), region = 40 }
  0x32   : > { %790 = dma.done.wait (%p1134_p1), [#allocation3], 64   ;;  %p1135_p0 = pmov %p1134_p1 }
  0x33   : > { %p231_p6 = scmp.lt.s32.totalorder %s884_s22, 1  ;;  %v814_v0 = vmov 0   ;;  %v815_v1 = vmov 2   ;;  %v238_v2 = vld [vmem:[#allocation2] sm:$0xf]  ;;  %s816_s8 = smov 19   ;;  %v254_v32 = vlaneseq }
  0x34   : > { %792 = vsyncadd (%p1135_p0), [#allocation3], 4294967232  ;;  %702 = vset.pattern.permute.xlu1 %v814_v0  ;;  %704 = vset.pattern.permute.xlu0 %v815_v1  ;;  %v817_v4 = vmov 1   ;;  %v818_v6 = vmov 4   ;;  %v819_v7 = vmov 5   ;;  %s820_s9 = smov 18  }
  0x35   : > { %s232_s25 = scalar_select %p231_p6, %s884_s22, 1  ;;  %262 = vperm.xlu1 %702, %v238_v2   ;;  %v821_v9 = vmov 3   ;;  %v823_v10 = vmov 6   ;;  %v825_v11 = vmov 7   ;;  %v239_v12 = vld [vmem:[%s1122_s2] sm:$0xf] }
  0x36   : > { %s822_s10 = smov 17   ;;  %s824_s11 = smov 1   ;;  %v828_v13 = vmov 8   ;;  %v434_v14 = vld [vmem:[%s1124_s4] sm:$0xff]  ;;  %v997_v35 = vand.u32 127, %v254_v32  ;;  %v1007_v53 = vshrl.u32 %v254_v32, 7 }
  0x37   : > { %s632_s26 = smul.u32 12, %s232_s25  ;;  %s826_s14 = smov 127   ;;  %v433_v15 = vld [vmem:[%s1123_s3] sm:$0xff]  ;;  %v831_v42 = vmov 839922192  }
  0x38   : > { %s827_s15 = smov 111   ;;  %s829_s16 = smov 110   ;;  %vm256_vm0 = vcmp.lt.s32.totalorder %v997_v35, 19  ;;  %v335_v43 = vunpack.c.l.s4 %v831_v42  ;;  %vm277_vm1 = vcmp.lt.s32.totalorder %v997_v35, 18  ;;  %vm297_vm2 = vcmp.lt.s32.totalorder %v997_v35, 17 }
  0x39   : > { %s235_s7 = scalar_lea.vmem %s1120_s0, %s632_s26  ;;  %703 = vset.pattern.permute.xlu1 %v817_v4  ;;  %s830_s17 = smov 109   ;;  %vm317_vm3 = vcmp.lt.s32.totalorder %v997_v35, 1  ;;  %vm356_vm4 = vcmp.lt.s32.totalorder %v997_v35, 127  ;;  %vm376_vm5 = vcmp.lt.s32.totalorder %v997_v35, 111  ;;  %vm396_vm6 = vcmp.lt.s32.totalorder %v997_v35, 110 }
  0x3a   : > { %v953_v3 = vld [vmem:[%s235_s7] sm:$0xff]  ;;  %282 = vperm.xlu1 %703, %v238_v2   ;;  %v957_v5 = vld [vmem:[%s235_s7 + $0x8] sm:$0xf]  ;;  %v336_v52 = vunpack.c.0.s8 %v335_v43  ;;  %vm416_vm7 = vcmp.lt.s32.totalorder %v997_v35, 109  ;;  %s228_s30 = sand.u32 1, %s803_s19   ;;  %p1136_p9 = scmp.ne.s32.totalorder %s1129_s28, 0 }
  0x3b   : > { %248 = vrot.lane.b32.xlu0 %v953_v3, %s816_s8  ;;  %v246_v8 = vcombine.high %v953_v3, %v953_v3  ;;  %s631_s7 = smul.u32 24, %s228_s30 }
  0x3e   : > { %705 = vset.pattern.permute.xlu1 %v818_v6 }
  0x3f   : > { %302 = vperm.xlu0 %704, %v238_v2   ;;  %332 = vperm.xlu1 %705, %v238_v2  }
  0x43   : > { %252 = vrot.lane.b32.xlu0 %v957_v5, %s816_s8  ;;  %250 = vrot.lane.b32.xlu1 %v246_v8, %s816_s8  ;;  %s633_s8 = smul.u32 384, %s884_s22  ;;  %s536_s22 = scalar_lea.sflag [#allocation4], %s228_s30 }
  0x44   : > { %707 = vset.pattern.permute.xlu0 %v819_v7  ;;  %706 = vset.pattern.permute.xlu1 %v821_v9 }
  0x45   : > { %s1076_s13 = scalar_lea.hbm %s1125_s5, %s633_s8 }
  0x47   : > { %271 = vrot.lane.b32.xlu0 %v953_v3, %s820_s9  ;;  %322 = vperm.xlu1 %706, %v238_v2  }
  0x4b   : > { %275 = vrot.lane.b32.xlu0 %v957_v5, %s820_s9  ;;  %273 = vrot.lane.b32.xlu1 %v246_v8, %s820_s9  ;;  %s230_s9 = scalar_lea.vmem [#allocation5], %s631_s7 }
  0x4c   : > { %708 = vset.pattern.permute.xlu1 %v823_v10 }
  0x4f   : > { %293 = vrot.lane.b32.xlu0 %v246_v8, %s822_s10  ;;  %291 = vrot.lane.b32.xlu1 %v953_v3, %s822_s10 }
  0x53   : > { %361 = vperm.xlu0 %707, %v238_v2   ;;  %295 = vrot.lane.b32.xlu1 %v957_v5, %s822_s10  ;;  %s550_s10 = sshll.u32 %s230_s9, 4  ;;  %s1078_s10 = int_to_ptr.vmem [resolvable:$true] %s550_s10 }
  0x57   : > { %315 = vrot.lane.b32.xlu0 %v957_v5, %s824_s11  ;;  %311 = vrot.lane.b32.xlu1 %v953_v3, %s824_s11 }
  0x58   : > { %709 = vset.pattern.permute.xlu0 %v825_v11 }
  0x5b   : > { %401 = vperm.xlu0 %709, %v238_v2   ;;  %313 = vrot.lane.b32.xlu1 %v246_v8, %s824_s11 }
  0x5f   : > { %710 = vset.pattern.permute.xlu0 %v814_v0  ;;  %381 = vperm.xlu1 %708, %v238_v2  }
  0x60   : > { %242 = vperm.xlu0 %710, %v239_v12  }
  0x63   : > { %350 = vrot.lane.b32.xlu1 %v953_v3, %s826_s14 }
  0x64   : > { %354 = vrot.lane.b32.xlu0 %v957_v5, %s826_s14  ;;  %711 = vset.pattern.permute.xlu1 %v828_v13 }
  0x67   : > { %352 = vrot.lane.b32.xlu1 %v246_v8, %s826_s14  ;;  %s745_s14 = scalar_lea.vmem %s1078_s10, 384 }
  0x68   : > { %370 = vrot.lane.b32.xlu0 %v953_v3, %s827_s15  ;;  %p746_p5 = scmp.ne.s32.totalorder %s1078_s10, %s745_s14 }
  0x6a   : > { %p747_p10 = pnand %p746_p5, %p1136_p9 }
  0x6b   : > { %421 = vperm.xlu1 %711, %v238_v2  }
  0x6c   : > { %374 = vrot.lane.b32.xlu0 %v957_v5, %s827_s15  ;;  %p748_p12 = pneg %p747_p10 }
  0x6f   : > { %372 = vrot.lane.b32.xlu1 %v246_v8, %s827_s15  ;;  %s832_s15 = smov [#allocation5]  }
  0x70   : > { %392 = vrot.lane.b32.xlu0 %v246_v8, %s829_s16  ;;  %712 = vset.pattern.permute.xlu1 %v814_v0 }
  0x73   : > { %390 = vrot.lane.b32.xlu1 %v953_v3, %s829_s16 }
  0x74   : > { %410 = vrot.lane.b32.xlu0 %v953_v3, %s830_s17 }
  0x77   : > { %394 = vrot.lane.b32.xlu1 %v957_v5, %s829_s16  ;;  %s749_s16 = sshll.u32 %s832_s15, 4  ;;  %s750_s16 = int_to_ptr.vmem [resolvable:$false] %s749_s16 }
  0x78   : > { %414 = vrot.lane.b32.xlu0 %v957_v5, %s830_s17  ;;  %p752_p2 = scmp.lt.s32.totalorder %s1078_s10, %s750_s16 }
  0x7b   : > { %412 = vrot.lane.b32.xlu1 %v246_v8, %s830_s17  ;;  %s751_s17 = scalar_lea.vmem %s750_s16, 768 }
  0x7c   : > { %437 = vperm.xlu0 %710, %v434_v14   ;;  %p753_p3 = scmp.lt.s32.totalorder %s751_s17, %s745_s14 }
  0x7e   : > { %p754_p4 = por %p753_p3, %p752_p2 }
  0x7f   : > { %454 = vperm.xlu1 %712, %v433_v15  }
  0x80   : > { %715 = vset.pattern.permute.xlu0 %v821_v9  ;;  %p755_p7 = pnand %p754_p4, %p748_p12 }
  0x81   : > { %520 = vperm.xlu0 %715, %v433_v15  }
  0x83   : > { %713 = vset.pattern.permute.xlu1 %v817_v4 }
  0x84   : > { %476 = vperm.xlu1 %713, %v433_v15  }
  0x88   : > { %714 = vset.pattern.permute.xlu1 %v815_v1  ;;  %v339_v1 = vsub.s32 %v336_v52, %v1007_v53 }
  0x89   : > { %498 = vperm.xlu1 %714, %v433_v15  }
  0xad   : > { %v249_v16 = vpop.permute.xlu0 %248 }
  0xb4   : > { %v263_v17 = vpop.permute.xlu1 %262 }
  0xb9   : > { %v283_v19 = vpop.permute.xlu1 %282 }
  0xbe   : > { %v989_v18 = vpop.permute.xlu0 %302  ;;  %v333_v21 = vpop.permute.xlu1 %332 }
  0xbf   : > { %v340_v15 = vrot.slane %v333_v21, %v339_v1 }
  0xc1   : > { %v342_v21 = vmul.f32 %v340_v15, %v953_v3 }
  0xc2   : > { %v253_v20 = vpop.permute.xlu0 %252  ;;  %v251_v23 = vpop.permute.xlu1 %250 }
  0xc3   : > { %v257_v38 = vsel %vm256_vm0, %v251_v23, %v253_v20  ;;  %v259_v40 = vsel %vm256_vm0, %v253_v20, %v249_v16  ;;  %v258_v46 = vsel %vm256_vm0, %v249_v16, %v251_v23  ;;  %v345_v43 = vcombine.high %v342_v21, %v342_v21 }
  0xc4   : > { %v267_v44 = vmul.f32 %v263_v17, %v257_v38  ;;  %v265_v45 = vmul.f32 %v263_v17, %v259_v40  ;;  %v266_v55 = vmul.f32 %v263_v17, %v258_v46 }
  0xc6   : > { %v272_v22 = vpop.permute.xlu0 %271  ;;  %v991_v25 = vpop.permute.xlu1 %322 }
  0xca   : > { %v276_v24 = vpop.permute.xlu0 %275  ;;  %v274_v27 = vpop.permute.xlu1 %273 }
  0xcb   : > { %v278_v47 = vsel %vm277_vm1, %v274_v27, %v276_v24  ;;  %v280_v49 = vsel %vm277_vm1, %v276_v24, %v272_v22  ;;  %v279_v58 = vsel %vm277_vm1, %v272_v22, %v274_v27 }
  0xcc   : > { %v287_v56 = vmul.f32 %v283_v19, %v278_v47  ;;  %v285_v57 = vmul.f32 %v283_v19, %v280_v49  ;;  %v286_v4 = vmul.f32 %v283_v19, %v279_v58 }
  0xce   : > { %v294_v26 = vpop.permute.xlu0 %293  ;;  %v292_v29 = vpop.permute.xlu1 %291 }
  0xcf   : > { %v299_v7 = vsel %vm297_vm2, %v292_v29, %v294_v26 }
  0xd0   : > { %v306_v17 = vmul.f32 %v989_v18, %v299_v7  ;;  %v442_v7 = vsub.s32 0, %v1007_v53 }
  0xd2   : > { %v993_v28 = vpop.permute.xlu0 %361  ;;  %v296_v31 = vpop.permute.xlu1 %295 }
  0xd3   : > { %v298_v59 = vsel %vm297_vm2, %v294_v26, %v296_v31  ;;  %v300_v61 = vsel %vm297_vm2, %v296_v31, %v292_v29  ;;  %v343_v31 = vmul.f32 %v340_v15, %v957_v5 }
  0xd4   : > { %v307_v6 = vmul.f32 %v989_v18, %v298_v59  ;;  %v305_v8 = vmul.f32 %v989_v18, %v300_v61 }
  0xd6   : > { %v316_v30 = vpop.permute.xlu0 %315  ;;  %v312_v34 = vpop.permute.xlu1 %311 }
  0xd7   : > { %v320_v11 = vsel %vm317_vm3, %v316_v30, %v312_v34 }
  0xd8   : > { %v325_v20 = vmul.f32 %v991_v25, %v320_v11 }
  0xda   : > { %v995_v33 = vpop.permute.xlu0 %401  ;;  %v314_v37 = vpop.permute.xlu1 %313 }
  0xdb   : > { %v318_v9 = vsel %vm317_vm3, %v314_v37, %v316_v30  ;;  %v319_v22 = vsel %vm317_vm3, %v312_v34, %v314_v37 }
  0xdc   : > { %v327_v19 = vmul.f32 %v991_v25, %v318_v9  ;;  %v326_v32 = vmul.f32 %v991_v25, %v319_v22  ;;  %v509_v22 = vsub.s32 3, %v1007_v53 }
  0xde   : > { %v1000_v41 = vpop.permute.xlu1 %381 }
  0xdf   : > { %v243_v36 = vpop.permute.xlu0 %242 }
  0xe0   : > { %v270_v50 = vadd.f32 %v267_v44, %v243_v36  ;;  %v268_v54 = vadd.f32 %v265_v45, %v243_v36  ;;  %v269_v62 = vadd.f32 %v266_v55, %v243_v36 }
  0xe2   : > { %v351_v51 = vpop.permute.xlu1 %350  ;;  %v290_v63 = vadd.f32 %v287_v56, %v270_v50  ;;  %v288_v2 = vadd.f32 %v285_v57, %v268_v54  ;;  %v289_v12 = vadd.f32 %v286_v4, %v269_v62 }
  0xe3   : > { %v355_v39 = vpop.permute.xlu0 %354 }
  0xe4   : > { %v310_v13 = vadd.f32 %v307_v6, %v290_v63  ;;  %v308_v16 = vadd.f32 %v305_v8, %v288_v2  ;;  %v359_v23 = vsel %vm356_vm4, %v355_v39, %v351_v51  ;;  %v309_v24 = vadd.f32 %v306_v17, %v289_v12 }
  0xe5   : > { %v366_v34 = vmul.f32 %v993_v28, %v359_v23 }
  0xe6   : > { %v353_v0 = vpop.permute.xlu1 %352  ;;  %v330_v26 = vadd.f32 %v327_v19, %v310_v13  ;;  %v328_v30 = vadd.f32 %v325_v20, %v308_v16  ;;  %v329_v38 = vadd.f32 %v326_v32, %v309_v24  ;;  %v465_v16 = vsub.s32 1, %v1007_v53 }
  0xe7   : > { %v371_v48 = vpop.permute.xlu0 %370  ;;  %v358_v18 = vsel %vm356_vm4, %v351_v51, %v353_v0  ;;  %v357_v37 = vsel %vm356_vm4, %v353_v0, %v355_v39 }
  0xe8   : > { %v349_v3 = vadd.f32 %v343_v31, %v330_v26  ;;  %v364_v40 = vmul.f32 %v993_v28, %v358_v18  ;;  %v347_v25 = vadd.f32 %v342_v21, %v328_v30  ;;  %v365_v46 = vmul.f32 %v993_v28, %v357_v37 }
  0xe9   : > { %v487_v30 = vsub.s32 2, %v1007_v53 }
  0xea   : > { %v422_v14 = vpop.permute.xlu1 %421  ;;  %v369_v45 = vadd.f32 %v366_v34, %v349_v3  ;;  %v367_v51 = vadd.f32 %v364_v40, %v347_v25 }
  0xeb   : > { %v375_v60 = vpop.permute.xlu0 %374 }
  0xec   : > { %v379_v36 = vsel %vm376_vm5, %v375_v60, %v371_v48 }
  0xed   : > { %v386_v39 = vmul.f32 %v1000_v41, %v379_v36 }
  0xee   : > { %v373_v29 = vpop.permute.xlu1 %372 }
  0xef   : > { %v393_v10 = vpop.permute.xlu0 %392  ;;  %v378_v42 = vsel %vm376_vm5, %v371_v48, %v373_v29  ;;  %v377_v44 = vsel %vm376_vm5, %v373_v29, %v375_v60  ;;  %v348_v48 = vadd.f32 %v345_v43, %v329_v38  ;;  %v389_v58 = vadd.f32 %v386_v39, %v369_v45 }
  0xf0   : > { %v384_v50 = vmul.f32 %v1000_v41, %v378_v42  ;;  %v385_v52 = vmul.f32 %v1000_v41, %v377_v44 }
  0xf1   : > { %v368_v59 = vadd.f32 %v365_v46, %v348_v48 }
  0xf2   : > { %v391_v5 = vpop.permute.xlu1 %390  ;;  %v387_v62 = vadd.f32 %v384_v50, %v367_v51 }
  0xf3   : > { %v411_v27 = vpop.permute.xlu0 %410  ;;  %v398_v49 = vsel %vm396_vm6, %v391_v5, %v393_v10  ;;  %v388_v41 = vadd.f32 %v385_v52, %v368_v59 }
  0xf4   : > { %v404_v56 = vmul.f32 %v995_v33, %v398_v49 }
  0xf6   : > { %v395_v54 = vpop.permute.xlu1 %394  ;;  %v407_v2 = vadd.f32 %v404_v56, %v387_v62 }
  0xf7   : > { %v415_v47 = vpop.permute.xlu0 %414  ;;  %v397_v57 = vsel %vm396_vm6, %v393_v10, %v395_v54  ;;  %v399_v28 = vsel %vm396_vm6, %v395_v54, %v391_v5 }
  0xf8   : > { %v419_v55 = vsel %vm416_vm7, %v415_v47, %v411_v27  ;;  %v405_v60 = vmul.f32 %v995_v33, %v397_v57  ;;  %v406_v61 = vmul.f32 %v995_v33, %v399_v28 }
  0xf9   : > { %v426_v63 = vmul.f32 %v422_v14, %v419_v55 }
  0xfa   : > { %v409_v0 = vadd.f32 %v406_v61, %v389_v58  ;;  %v413_v1 = vpop.permute.xlu1 %412  ;;  %v408_v8 = vadd.f32 %v405_v60, %v388_v41 }
  0xfb   : > { %v417_v4 = vsel %vm416_vm7, %v413_v1, %v415_v47  ;;  %v418_v6 = vsel %vm416_vm7, %v411_v27, %v413_v1  ;;  %v438_v26 = vpop.permute.xlu0 %437 }
  0xfc   : > { %v429_v9 = vadd.f32 %v426_v63, %v409_v0  ;;  %v424_v10 = vmul.f32 %v422_v14, %v418_v6  ;;  %v425_v11 = vmul.f32 %v422_v14, %v417_v4 }
  0xfe   : > { %v432_v33 = vmax.f32 %v429_v9, 0.0  ;;  %v427_v12 = vadd.f32 %v424_v10, %v407_v2  ;;  %v428_v13 = vadd.f32 %v425_v11, %v408_v8  ;;  %v455_v15 = vpop.permute.xlu1 %454 }
 0x100   : > { %v430_v17 = vmax.f32 %v427_v12, 0.0  ;;  %v431_v19 = vmax.f32 %v428_v13, 0.0  ;;  %v451_v20 = vrot.slane %v432_v33, %v442_v7  ;;  %v474_v14 = vrot.slane %v432_v33, %v465_v16  ;;  %v521_v5 = vpop.permute.xlu0 %520 }
 0x101   : > { %v518_v36 = vrot.slane %v432_v33, %v509_v22  ;;  %v496_v45 = vrot.slane %v432_v33, %v487_v30 }
 0x102   : > { %v443_v35 = vrot.slane %v430_v17, %v442_v7  ;;  %v447_v23 = vrot.slane %v431_v19, %v442_v7  ;;  %v459_v24 = vmul.f32 %v455_v15, %v451_v20  ;;  %v466_v27 = vrot.slane %v430_v17, %v465_v16 }
 0x103   : > { %v470_v29 = vrot.slane %v431_v19, %v465_v16  ;;  %v477_v21 = vpop.permute.xlu1 %476  ;;  %v510_v34 = vrot.slane %v430_v17, %v509_v22  ;;  %v514_v43 = vrot.slane %v431_v19, %v509_v22  ;;  %v488_v25 = vrot.slane %v430_v17, %v487_v30 }
 0x104   : > { %v457_v18 = vmul.f32 %v455_v15, %v443_v35  ;;  %v458_v31 = vmul.f32 %v455_v15, %v447_v23  ;;  %v462_v32 = vadd.f32 %v459_v24, %v438_v26  ;;  %v481_v37 = vmul.f32 %v477_v21, %v474_v14 }
 0x105   : > { %v479_v40 = vmul.f32 %v477_v21, %v466_v27  ;;  %v480_v42 = vmul.f32 %v477_v21, %v470_v29  ;;  %v492_v44 = vrot.slane %v431_v19, %v487_v30  ;;  %v523_v51 = vmul.f32 %v521_v5, %v510_v34 }
 0x106   : > { %v460_v38 = vadd.f32 %v457_v18, %v438_v26  ;;  %v461_v3 = vadd.f32 %v458_v31, %v438_v26  ;;  %v484_v47 = vadd.f32 %v481_v37, %v462_v32  ;;  %v525_v52 = vmul.f32 %v521_v5, %v518_v36 }
 0x107   : > { %v524_v54 = vmul.f32 %v521_v5, %v514_v43 }
 0x108   : > { %v482_v39 = vadd.f32 %v479_v40, %v460_v38  ;;  %v483_v53 = vadd.f32 %v480_v42, %v461_v3  ;;  %v499_v46 = vpop.permute.xlu1 %498 }
 0x109   : > { %v501_v49 = vmul.f32 %v499_v46, %v488_v25  ;;  %v502_v50 = vmul.f32 %v499_v46, %v492_v44  ;;  %v503_v48 = vmul.f32 %v499_v46, %v496_v45 }
 0x10b   : > { %v504_v55 = vadd.f32 %v501_v49, %v482_v39  ;;  %v505_v56 = vadd.f32 %v502_v50, %v483_v53  ;;  %v506_v57 = vadd.f32 %v503_v48, %v484_v47 }
 0x10d   : > { %v526_v28 = vadd.f32 %v523_v51, %v504_v55  ;;  %v527_v58 = vadd.f32 %v524_v54, %v505_v56  ;;  %v528_v59 = vadd.f32 %v525_v52, %v506_v57 }
 0x10f   : > { %v529_v60 = vmax.f32 %v526_v28, 0.0  ;;  %v530_v61 = vmax.f32 %v527_v58, 0.0  ;;  %v531_v62 = vmax.f32 %v528_v59, 0.0 }
 0x111   : > { %532 = vst [vmem:[%s230_s9] sm:$0xff] %v529_v60  ;;  %533 = vst [vmem:[%s230_s9 + $0x8] sm:$0xff] %v530_v61 }
 0x112   : > { %534 = vst [vmem:[%s230_s9 + $0x10] sm:$0xff] %v531_v62 }
 0x113   : > { %758 = shalt.err (!%p755_p7)
}
 0x114   : > { %s759_s23 = scalar_lea.hbm %s1076_s13, 384  ;;  %s763_s6 = scalar_lea.hbm %s1125_s5, 768 }
 0x115   : > { %p760_p8 = scmp.ne.s32.totalorder %s1076_s13, %s759_s23  ;;  %p764_p1 = scmp.lt.u32.totalorder %s1076_s13, %s1125_s5 }
 0x116   : > { %p765_p0 = scmp.lt.u32.totalorder %s763_s6, %s759_s23  ;;  %p767_p5 = scmp.lt.u32.totalorder %s759_s23, %s1076_s13 }
 0x117   : > { %p761_p11 = pnand %p760_p8, %p1136_p9 }
 0x118   : > { %p766_p6 = por %p765_p0, %p764_p1 }
 0x119   : > { %p762_p13 = pneg %p761_p11 }
 0x11a   : > { %p768_p10 = por %p767_p5, %p766_p6 }
 0x11c   : > { %p769_p12 = pnand %p768_p10, %p762_p13 }
 0x11e   : > { %772 = shalt.err (!%p769_p12)
}
 0x11f   : > { %638 = dma.vmem_to_hbm [thread:$0]  (%p1136_p9), %s1078_s10, 384, %s1076_s13, %s536_s22  }
 0x120 PF: > { %p650_p2 = scmp.ge.s32.totalorder %s811_s21, 2  ;;  %s562_s8 = sand.u32 1, %s799_s18  }
 0x121   : > { %p1137_p3 = scmp.ne.s32.totalorder %s1130_s29, 0  ;;  %s563_s9 = scalar_lea.sflag [#allocation4], %s562_s8 }
 0x123   : > { %p645_p4 = pnand %p650_p2, %p1137_p3 }
 0x125   : > { %794 = dma.done.wait (!%p645_p4), %s563_s9, 384  }
 0x126   : > { %796 = vsyncadd (!%p645_p4), %s563_s9, 4294966912  ;;  %p16_p7 = scmp.ge.s32.totalorder %s888_s24, 4   ;;  %s1138_s18 = smov %s803_s19 }
 0x127   : > { %s1139_s19 = smov %s807_s20  ;;  %s1140_s20 = smov %s899_s27 }
 0x128   : > { %s1141_s21 = smov %s888_s24  ;;  %18 = sbr.rel (!%p16_p7) target bundleno = 4 (0x4), region = 80 }
 0x12f   :  { %568 = vsyncpa [#allocation3], 1 }
 0x130   :  { %570 = vsyncpa [#allocation3 + $0x1], 1 }
 0x131   :  { %571 = vsyncpa [#allocation4], 1 }
 0x132   :  { %573 = vsyncpa [#allocation4 + $0x1], 1 }

</bundles_post_ra>
